<compile_context>
chip_gen: v6e
topology: v6e:2x2x1
jax: 0.10.0
libtpu: 0.0.40
codegen_flags: <defaults>
</compile_context>

<pallas_src>
import jax
import jax.numpy as jnp
from jax.experimental import pallas as pl
from jax.experimental.pallas import tpu as pltpu


def _bias_kernel(alpha_ref, beta_ref, x_ref, o_ref):
    # alpha/beta live in SMEM as (1,) float32 scalars.
    alpha = alpha_ref[0]
    beta = beta_ref[0]
    x = x_ref[...].astype(jnp.float32)
    o_ref[...] = (alpha * x + beta).astype(o_ref.dtype)


def bias_layer(x, alpha, beta, *, target_block_bytes=2 * 1024 * 1024):
    """Applies y = alpha * x + beta elementwise via a Pallas TPU kernel.

    x: arbitrary-shaped float array (e.g. NCHW).
    alpha, beta: scalar parameters, shape (1,) like nn.Parameter(torch.ones(1)).
    """
    orig_shape = x.shape
    orig_dtype = x.dtype
    n = x.size
    itemsize = jnp.dtype(orig_dtype).itemsize

    # Parameters kept in float32 regardless of x's dtype (PyTorch semantics).
    alpha32 = jnp.asarray(alpha, dtype=jnp.float32).reshape((1,))
    beta32 = jnp.asarray(beta, dtype=jnp.float32).reshape((1,))

    # ---- Pick a lane-dense 2-D slab (rows, lanes), avoiding padding copies. ----
    lanes = None
    for w in (2048, 1024, 512, 256, 128):
        if n % w == 0:
            lanes = w
            break

    x_flat = jnp.reshape(x, (-1,))
    if lanes is None:
        # Ragged fallback: pad the flat tail up to a lane multiple (one extra
        # HBM copy; only hit when n is not a multiple of 128).
        lanes = 128
        n_pad = pl.cdiv(n, lanes) * lanes
        x_flat = jnp.pad(x_flat, (0, n_pad - n))
    else:
        n_pad = n
    rows = n_pad // lanes
    x2d = jnp.reshape(x_flat, (rows, lanes))

    # ---- Pick a big block (~target_block_bytes per tile). With double-buffered
    # input + output the VMEM footprint is ~4x block bytes: <= ~8 MiB here,
    # safe on v5e/v6e (128 MiB) and v7x (64 MiB per TC).
    bytes_per_row = lanes * itemsize
    block_rows = max(1, target_block_bytes // bytes_per_row)
    if block_rows >= rows:
        block_rows = rows  # single block along rows (full extent is legal)
    else:
        # Keep the second-to-last block dim a multiple of the native sublane
        # packing (8 for f32, 16 for bf16, 32 for int8).
        sublane = {4: 8, 2: 16, 1: 32}.get(itemsize, 8)
        block_rows = max(sublane, (block_rows // sublane) * sublane)

    grid = (pl.cdiv(rows, block_rows),)

    out2d = pl.pallas_call(
        _bias_kernel,
        out_shape=jax.ShapeDtypeStruct((rows, lanes), orig_dtype),
        grid=grid,
        in_specs=[
            pl.BlockSpec(memory_space=pltpu.SMEM),   # alpha (1,) f32
            pl.BlockSpec(memory_space=pltpu.SMEM),   # beta  (1,) f32
            pl.BlockSpec((block_rows, lanes), lambda i: (i, 0)),
        ],
        out_specs=pl.BlockSpec((block_rows, lanes), lambda i: (i, 0)),
        # Write in place when possible (XLA copies if the caller still needs x).
        input_output_aliases={2: 0},
        compiler_params=pltpu.CompilerParams(
            dimension_semantics=("parallel",),        # shard grid across TCs (v7x)
            vmem_limit_bytes=64 * 1024 * 1024,        # lift v5e's 16 MiB scoped default
        ),
    )(alpha32, beta32, x2d)

    if n_pad != n:
        out_flat = jnp.reshape(out2d, (-1,))[:n]
        return jnp.reshape(out_flat, orig_shape)
    return jnp.reshape(out2d, orig_shape)


if __name__ == "__main__":
    key = jax.random.PRNGKey(0)

    # BiasLayer init is alpha = ones(1), beta = zeros(1); use non-trivial
    # values so the check is meaningful.
    alpha = jnp.ones((1,), dtype=jnp.float32) * 1.5
    beta = jnp.zeros((1,), dtype=jnp.float32) + 0.25

    # Primary check: NCHW input matching the module's conv-style usage.
    x = jax.random.normal(key, (2, 4, 16, 16), dtype=jnp.float32)
    y_ref = alpha[0] * x + beta[0]
    y = jax.block_until_ready(bias_layer(x, alpha, beta))
    assert y.shape == x.shape and y.dtype == x.dtype
    assert jnp.allclose(y, y_ref, atol=1e-6, rtol=1e-6)

    # Multi-block path (grid > 1) with a small block-size override.
    x2 = jax.random.normal(jax.random.PRNGKey(1), (2, 4, 64, 128), dtype=jnp.float32)
    y2_ref = alpha[0] * x2 + beta[0]
    y2 = jax.block_until_ready(
        bias_layer(x2, alpha, beta, target_block_bytes=32 * 1024))
    assert jnp.allclose(y2, y2_ref, atol=1e-6, rtol=1e-6)

    # Ragged size (not a multiple of 128) exercises the padded fallback path.
    x3 = jax.random.normal(jax.random.PRNGKey(2), (3, 5, 7, 11), dtype=jnp.float32)
    y3_ref = alpha[0] * x3 + beta[0]
    y3 = jax.block_until_ready(bias_layer(x3, alpha, beta))
    assert y3.shape == x3.shape
    assert jnp.allclose(y3, y3_ref, atol=1e-6, rtol=1e-6)

    # bf16 input: parameters stay f32 inside the kernel (PyTorch semantics).
    x4 = jax.random.normal(jax.random.PRNGKey(3), (2, 4, 16, 16)).astype(jnp.bfloat16)
    y4_ref = (alpha[0] * x4.astype(jnp.float32) + beta[0]).astype(jnp.bfloat16)
    y4 = jax.block_until_ready(bias_layer(x4, alpha, beta))
    assert y4.dtype == jnp.bfloat16
    assert jnp.allclose(y4.astype(jnp.float32), y4_ref.astype(jnp.float32),
                        atol=1e-2, rtol=1e-2)

    print("KERNEL_OK")
</pallas_src>

<mosaic_0001>
module attributes {stable_mosaic.version = 11 : i64} {
  func.func @_bias_kernel(%arg0: i32, %arg1: memref<1xf32, #tpu.memory_space<smem>>, %arg2: memref<1xf32, #tpu.memory_space<smem>>, %arg3: memref<1x2048xf32, #tpu.memory_space<vmem>>, %arg4: memref<1x2048xf32, #tpu.memory_space<vmem>>) attributes {dimension_semantics = [#tpu.dimension_semantics<parallel>], iteration_bounds = array<i64: 1>, scalar_prefetch = 0 : i64, scratch_operands = 0 : i64, tpu.core_type = #tpu.core_type<tc>, window_params = [{transform_indices = @transform_0, window_bounds = array<i64: 1>}, {transform_indices = @transform_1, window_bounds = array<i64: 1>}, {transform_indices = @transform_2, window_bounds = array<i64: 1, 2048>}, {transform_indices = @transform_3, window_bounds = array<i64: 1, 2048>}]} {
    %c0 = arith.constant 0 : index
    %0 = memref.load %arg1[%c0] : memref<1xf32, #tpu.memory_space<smem>>
    %c0_0 = arith.constant 0 : index
    %1 = memref.load %arg2[%c0_0] : memref<1xf32, #tpu.memory_space<smem>>
    %c0_1 = arith.constant 0 : index
    %c0_2 = arith.constant 0 : index
    %2 = vector.load %arg3[%c0_1, %c0_2] : memref<1x2048xf32, #tpu.memory_space<vmem>>, vector<1x2048xf32>
    %3 = vector.broadcast %0 : f32 to vector<1x2048xf32>
    %4 = arith.mulf %3, %2 : vector<1x2048xf32>
    %5 = vector.broadcast %1 : f32 to vector<1x2048xf32>
    %6 = arith.addf %4, %5 : vector<1x2048xf32>
    %c0_3 = arith.constant 0 : index
    %c0_4 = arith.constant 0 : index
    %7 = vector.load %arg4[%c0_3, %c0_4] : memref<1x2048xf32, #tpu.memory_space<vmem>>, vector<1x2048xf32>
    tpu.vector_store %arg4[%c0_3, %c0_4], %6 {strides = array<i32>} : memref<1x2048xf32, #tpu.memory_space<vmem>>, vector<1x2048xf32>,
    return
  }
  func.func @transform_0(%arg0: i32) -> i32 {
    %c0_i32 = arith.constant 0 : i32
    %c0_i32_0 = arith.constant 0 : i32
    return %c0_i32 : i32
  }
  func.func @transform_1(%arg0: i32) -> i32 {
    %c0_i32 = arith.constant 0 : i32
    %c0_i32_0 = arith.constant 0 : i32
    return %c0_i32 : i32
  }
  func.func @transform_2(%arg0: i32) -> (i32, i32) {
    %c0_i32 = arith.constant 0 : i32
    %c0_i32_0 = arith.constant 0 : i32
    return %arg0, %c0_i32 : i32, i32
  }
  func.func @transform_3(%arg0: i32) -> (i32, i32) {
    %c0_i32 = arith.constant 0 : i32
    %c0_i32_0 = arith.constant 0 : i32
    return %arg0, %c0_i32 : i32, i32
  }
}

</mosaic_0001>

<bundles_post_ra>
// kernel: tpu_custom_call.1
= control target key start
LH: loop header
LB: loop body
LE: loop exit
PB: predicated region body
PF: predicated region fallthrough
CT: control target
= control target key end

     0   :  { %10 = vsyncpa [#allocation5], 0  ;;  %s136_s0 = inlined_call_operand.<no memory space> [shape: f32[1], index: 0, kind: input, shape index: {}]   ;;  %s137_s1 = inlined_call_operand.<no memory space> [shape: f32[1], index: 1, kind: input, shape index: {}]   ;;  %s138_s2 = inlined_call_operand.hbm [shape: f32[1,2048], index: 2, kind: input, shape index: {}, may-alias: {2,3}]   ;;  %s139_s3 = inlined_call_operand.hbm [shape: f32[1,2048], index: 3, kind: output, shape index: {}, may-alias: {2,3}]  }
   0x1   :  { %11 = vsyncpa [#allocation6], 0  ;;  %s102_s12 = smov [#allocation4]  }
   0x2   :  { %s22_s13 = sshll.u32 %s102_s12, 4  ;;  %s23_s13 = int_to_ptr.vmem [resolvable:$true] %s22_s13 }
   0x3   :  { %s66_s14 = scalar_lea.vmem %s23_s13, 256  ;;  %p71_p1 = scmp.lt.s32.totalorder %s23_s13, %s23_s13 }
   0x4   :  { %p67_p0 = scmp.ne.s32.totalorder %s23_s13, %s66_s14  ;;  %p72_p2 = scmp.lt.s32.totalorder %s66_s14, %s66_s14 }
   0x6   :  { %p73_p3 = por %p72_p2, %p71_p1 }
   0x8   :  { %p74_p4 = pnand %p73_p3, %p67_p0 }
   0xa   :  { %77 = shalt.err (!%p74_p4)
}
   0xb   :  { %25 = dma.hbm_to_vmem [thread:$0]  %s138_s2, 256, %s23_s13, [#allocation5]  }
   0xc   :  { %98 = dma.done.wait [#allocation5], 256  }
   0xd   :  { %99 = vsyncadd [#allocation5], 4294967040  ;;  %v33_v0 = vstv %s136_s0  ;;  %v31_v1 = vld [vmem:[#allocation4] sm:$0xff]  ;;  %v36_v2 = vstv %s137_s1  ;;  %v32_v3 = vld [vmem:[#allocation4 + $0x8] sm:$0xff]  ;;  %s103_s21 = smov [#allocation7]  }
   0xe   :  { %s47_s22 = sshll.u32 %s103_s21, 4  ;;  %v34_v4 = vmul.f32 %v33_v0, %v31_v1  ;;  %v35_v5 = vmul.f32 %v33_v0, %v32_v3  ;;  %s48_s22 = int_to_ptr.vmem [resolvable:$true] %s47_s22 }
   0xf   :  { %s78_s2 = scalar_lea.vmem %s48_s22, 256  ;;  %p83_p6 = scmp.lt.s32.totalorder %s48_s22, %s48_s22 }
  0x10   :  { %v37_v6 = vadd.f32 %v36_v2, %v34_v4  ;;  %v38_v7 = vadd.f32 %v36_v2, %v35_v5  ;;  %p79_p5 = scmp.ne.s32.totalorder %s48_s22, %s78_s2  ;;  %p84_p7 = scmp.lt.s32.totalorder %s78_s2, %s78_s2 }
  0x12   :  { %39 = vst [vmem:[#allocation7] sm:$0xff] %v37_v6  ;;  %40 = vst [vmem:[#allocation7 + $0x8] sm:$0xff] %v38_v7  ;;  %p85_p8 = por %p84_p7, %p83_p6 }
  0x14   :  { %p86_p9 = pnand %p85_p8, %p79_p5 }
  0x16   :  { %89 = shalt.err (!%p86_p9)
}
  0x17   :  { %50 = dma.vmem_to_hbm [thread:$0]  %s48_s22, 256, %s139_s3, [#allocation6]  }
  0x18   :  { %100 = dma.done.wait [#allocation6], 256  }
  0x19   :  { %101 = vsyncadd [#allocation6], 4294967040 }
  0x1a   :  { %54 = vsyncpa [#allocation5], 1 }
  0x1b   :  { %55 = vsyncpa [#allocation6], 1 }

</bundles_post_ra>
